<compile_context>
chip_gen: v5e
topology: v5e:2x2
jax: 0.10.0
libtpu: 0.0.40
codegen_flags: <defaults>
</compile_context>

<pallas_src>
import functools

import jax
import jax.numpy as jnp
import numpy as np
from jax.experimental import pallas as pl
from jax.experimental.pallas import tpu as pltpu

_LANES = 128
_ROWS = 32          # sublane rows of the species slab; matches int8 (32,128) tiling


def _round_up(x: int, m: int) -> int:
    return ((x + m - 1) // m) * m


def _cdiv(a: int, b: int) -> int:
    return -(-a // b)


def _species_count_kernel(species_ref, out_ref, *, n_species, acc_w):
    """Count atoms per species for one (ROWS, tile_cols) species tile.

    species_ref : VMEM (ROWS, tile_cols) int8/int32 -- wrapped ids, pad == n_species
    out_ref     : VMEM (n_species, ROWS, acc_w) int32 -- per-chunk slot counters,
                  resident across the 'arbitrary' grid axis (accumulator).
    """
    @pl.when(pl.program_id(1) == 0)
    def _init():
        out_ref[...] = jnp.zeros_like(out_ref)

    tile_cols = species_ref.shape[1]
    k_chunks = tile_cols // acc_w

    @pl.loop(0, k_chunks)
    def _fold(k):
        start = pl.multiple_of(k * acc_w, acc_w)
        # int8 -> int32 widen once; everything downstream is plain i32 VPU work.
        sp = species_ref[:, pl.ds(start, acc_w)].astype(jnp.int32)
        for s in range(n_species):          # tiny static unroll over the table
            out_ref[s] = out_ref[s] + (sp == s).astype(jnp.int32)
        # Padding entries (value == n_species) match nothing -> contribute 0.


def _species_counts_pallas(species_wrapped, n_species, *, min_tile_cols=8192,
                           max_tile_cols=65536, acc_width=512):
    """Exact per-species atom counts (int32) via the Pallas kernel.

    species_wrapped : 1-D int32 with negative indices already wrapped; values
                      outside [0, n_species) simply contribute to no species.
    """
    n_atoms = int(species_wrapped.shape[0])

    # --- tile geometry: big lane-dense tiles amortize per-grid-step overhead,
    #     but target >= ~4 total tiles so padding waste stays bounded.
    cols = max(1, _cdiv(n_atoms, _ROWS))
    tile_cols = _round_up(_cdiv(cols, 4), _LANES)
    tile_cols = max(min_tile_cols, min(max_tile_cols, tile_cols))
    acc_w = min(acc_width, tile_cols)               # fixed accumulator width
    tile_cols = _round_up(tile_cols, acc_w)
    total_tiles = max(1, _cdiv(cols, tile_cols))
    n_chunks = 2 if total_tiles >= 2 else 1         # leading 'parallel' axis (v7x megacore)
    steps = _cdiv(total_tiles, n_chunks)
    padded_cols = n_chunks * steps * tile_cols

    # --- single layout-prep pass: wrap was applied upstream; here we downcast to
    #     int8 (4x less kernel DMA), pad with `n_species` and reshape to the slab.
    sp_dtype = jnp.int8 if n_species < 127 else jnp.int32
    sp = species_wrapped.astype(sp_dtype)
    pad = _ROWS * padded_cols - n_atoms
    if pad > 0:
        sp = jnp.concatenate([sp, jnp.full((pad,), n_species, sp_dtype)])
    sp2 = sp.reshape(_ROWS, padded_cols)

    kernel = functools.partial(_species_count_kernel,
                               n_species=n_species, acc_w=acc_w)
    out = pl.pallas_call(
        kernel,
        out_shape=jax.ShapeDtypeStruct((n_chunks * n_species, _ROWS, acc_w),
                                       jnp.int32),
        grid=(n_chunks, steps),
        in_specs=[
            # Species slab marches along the lane axis; chunk c owns `steps` tiles.
            pl.BlockSpec((_ROWS, tile_cols), lambda c, j: (0, c * steps + j)),
        ],
        # Per-chunk lane-dense partial-count block, resident across the reduction.
        out_specs=pl.BlockSpec((n_species, _ROWS, acc_w), lambda c, j: (c, 0, 0)),
        compiler_params=pltpu.CompilerParams(
            dimension_semantics=("parallel", "arbitrary")),
    )(sp2)

    # Tiny on-device reduce of the partials -> (n_species,) exact counts.
    return out.reshape(n_chunks, n_species, _ROWS, acc_w).sum(axis=(0, 2, 3))


def energy_shifter_forward(species, self_energies, energies, *,
                           force_kernel=False, small_n_threshold=131072,
                           min_tile_cols=8192, max_tile_cols=65536,
                           acc_width=512):
    """JAX/Pallas equivalent of EnergyShifter.forward((species, energies))."""
    table64 = np.asarray(self_energies, dtype=np.float64).reshape(-1)
    n_species = int(table64.shape[0])

    sp_flat = jnp.ravel(species).astype(jnp.int32)
    n_atoms = int(sp_flat.shape[0])
    # PyTorch gather semantics: negative indices wrap to the end of the table.
    sp_wrapped = jnp.where(sp_flat < 0, sp_flat + n_species, sp_flat)

    if force_kernel or n_atoms >= small_n_threshold:
        counts = _species_counts_pallas(
            sp_wrapped, n_species, min_tile_cols=min_tile_cols,
            max_tile_cols=max_tile_cols, acc_width=acc_width)
    else:
        # Small problems: pallas_call launch + layout prep cost more than the work.
        counts = (sp_wrapped[:, None]
                  == jnp.arange(n_species, dtype=jnp.int32)[None, :]).sum(
                      axis=0, dtype=jnp.int32)

    # Host-side float64 combine. Counts are bit-exact, so this matches the
    # PyTorch double-precision buffer; the device sync mirrors torch's .item().
    counts64 = np.asarray(jax.device_get(counts), dtype=np.float64)
    sae = float(counts64 @ table64)

    shifted = (energies + sae).astype(energies.dtype)   # tiny broadcast add (XLA)
    return species, shifted


if __name__ == "__main__":
    # Deterministic self-energy "buffer" (ANI-style values, H/C/N/O), float64 like
    # the registered double buffer in the PyTorch module. Built in-script.
    species_order = ("H", "C", "N", "O")
    sae_values = {"H": -0.600952980000, "C": -38.08316124000,
                  "N": -54.70775770000, "O": -75.19446356000}
    self_energies = np.asarray([sae_values[s] for s in species_order],
                               dtype=np.float64)
    n_species = len(species_order)

    def reference(species, energies):
        sp = np.asarray(species, dtype=np.int64).reshape(-1)
        sp = np.where(sp < 0, sp + n_species, sp)
        sae = self_energies[sp].sum()
        return np.asarray(energies, dtype=np.float64) + sae

    key = jax.random.PRNGKey(0)
    k1, k2, k3, k4 = jax.random.split(key, 4)

    # Case 1: small molecule batch forced through the kernel (single tile, heavy
    # padding, -1 entries exercise the negative-index wrap).
    species_a = jax.random.randint(k1, (300,), -1, n_species, dtype=jnp.int32)
    energies_a = jax.random.normal(k2, (5,), dtype=jnp.float32)
    out_sp_a, out_en_a = energy_shifter_forward(
        species_a, self_energies, energies_a, force_kernel=True)
    out_en_a = jax.block_until_ready(out_en_a)
    assert np.allclose(np.asarray(out_en_a, np.float64),
                       reference(species_a, energies_a), rtol=1e-5, atol=1e-3)
    assert np.array_equal(np.asarray(out_sp_a), np.asarray(species_a))

    # Case 2: forced tiny tiles so the (parallel chunks x arbitrary steps) grid,
    # cross-step accumulation and partial-tile padding are all exercised.
    species_b = jax.random.randint(k3, (20000,), -1, n_species, dtype=jnp.int32)
    energies_b = jax.random.normal(k4, (7,), dtype=jnp.float32)
    out_sp_b, out_en_b = energy_shifter_forward(
        species_b, self_energies, energies_b, force_kernel=True,
        min_tile_cols=128, max_tile_cols=128, acc_width=128)
    out_en_b = jax.block_until_ready(out_en_b)
    assert np.allclose(np.asarray(out_en_b, np.float64),
                       reference(species_b, energies_b), rtol=1e-5, atol=1e-3)

    # Case 3: small-N fallback path (no Pallas launch).
    out_sp_c, out_en_c = energy_shifter_forward(species_a, self_energies, energies_a)
    out_en_c = jax.block_until_ready(out_en_c)
    assert np.allclose(np.asarray(out_en_c, np.float64),
                       reference(species_a, energies_a), rtol=1e-5, atol=1e-3)

    print("KERNEL_OK")
</pallas_src>

<mosaic_0001>
module attributes {stable_mosaic.version = 11 : i64} {
  func.func @_species_count_kernel(%arg0: i32, %arg1: i32, %arg2: memref<32x8192xi8, #tpu.memory_space<vmem>>, %arg3: memref<4x32x512xi32, #tpu.memory_space<vmem>>) attributes {dimension_semantics = [#tpu.dimension_semantics<parallel>, #tpu.dimension_semantics<arbitrary>], iteration_bounds = array<i64: 1, 1>, scalar_prefetch = 0 : i64, scratch_operands = 0 : i64, tpu.core_type = #tpu.core_type<tc>, window_params = [{transform_indices = @transform_0, window_bounds = array<i64: 32, 8192>}, {transform_indices = @transform_1, window_bounds = array<i64: 4, 32, 512>}]} {
    %c0_i32 = arith.constant 0 : i32
    %0 = arith.cmpi eq, %arg1, %c0_i32 : i32
    %1 = arith.extui %0 : i1 to i32
    %c0_i32_0 = arith.constant 0 : i32
    %2 = arith.cmpi ne, %1, %c0_i32_0 : i32
    scf.if %2 {
      %c0_i32_3 = arith.constant 0 : i32
      %4 = vector.broadcast %c0_i32_3 : i32 to vector<4x32x512xi32>
      %c0 = arith.constant 0 : index
      %c0_4 = arith.constant 0 : index
      %c0_5 = arith.constant 0 : index
      %5 = vector.load %arg3[%c0, %c0_4, %c0_5] : memref<4x32x512xi32, #tpu.memory_space<vmem>>, vector<4x32x512xi32>
      tpu.vector_store %arg3[%c0, %c0_4, %c0_5], %4 {strides = array<i32>} : memref<4x32x512xi32, #tpu.memory_space<vmem>>, vector<4x32x512xi32>,
    } else {
    }
    %c0_i32_1 = arith.constant 0 : i32
    %c16_i32 = arith.constant 16 : i32
    %3 = arith.addi %c0_i32_1, %c16_i32 : i32
    %c1_i32 = arith.constant 1 : i32
    scf.for %arg4 = %c0_i32_1 to %3 step %c1_i32  : i32 {
      %c1_i32_3 = arith.constant 1 : i32
      %4 = arith.muli %arg4, %c1_i32_3 : i32
      %c0_i32_4 = arith.constant 0 : i32
      %5 = arith.addi %c0_i32_4, %4 : i32
      %c512_i32 = arith.constant 512 : i32
      %6 = arith.muli %5, %c512_i32 : i32
      %7 = tpu.assume_multiple %6, 512 : i32
      %c0 = arith.constant 0 : index
      %8 = arith.index_cast %7 : i32 to index
      %9 = vector.load %arg2[%c0, %8] : memref<32x8192xi8, #tpu.memory_space<vmem>>, vector<32x512xi8>
      %10 = arith.extsi %9 : vector<32x512xi8> to vector<32x512xi32>
      %c0_5 = arith.constant 0 : index
      %c0_6 = arith.constant 0 : index
      %c0_7 = arith.constant 0 : index
      %11 = vector.load %arg3[%c0_5, %c0_6, %c0_7] : memref<4x32x512xi32, #tpu.memory_space<vmem>>, vector<1x32x512xi32>
      %12 = vector.shape_cast %11 : vector<1x32x512xi32> to vector<32x512xi32>
      %c0_i32_8 = arith.constant 0 : i32
      %13 = vector.broadcast %c0_i32_8 : i32 to vector<32x512xi32>
      %14 = arith.cmpi eq, %10, %13 : vector<32x512xi32>
      %15 = arith.extui %14 : vector<32x512xi1> to vector<32x512xi32>
      %16 = arith.addi %12, %15 : vector<32x512xi32>
      %c0_9 = arith.constant 0 : index
      %c0_10 = arith.constant 0 : index
      %c0_11 = arith.constant 0 : index
      %17 = vector.load %arg3[%c0_9, %c0_10, %c0_11] : memref<4x32x512xi32, #tpu.memory_space<vmem>>, vector<1x32x512xi32>
      %18 = vector.shape_cast %17 : vector<1x32x512xi32> to vector<32x512xi32>
      %19 = vector.shape_cast %16 : vector<32x512xi32> to vector<1x32x512xi32>
      tpu.vector_store %arg3[%c0_9, %c0_10, %c0_11], %19 {strides = array<i32>} : memref<4x32x512xi32, #tpu.memory_space<vmem>>, vector<1x32x512xi32>,
      %c1 = arith.constant 1 : index
      %c0_12 = arith.constant 0 : index
      %c0_13 = arith.constant 0 : index
      %20 = vector.load %arg3[%c1, %c0_12, %c0_13] : memref<4x32x512xi32, #tpu.memory_space<vmem>>, vector<1x32x512xi32>
      %21 = vector.shape_cast %20 : vector<1x32x512xi32> to vector<32x512xi32>
      %c1_i32_14 = arith.constant 1 : i32
      %22 = vector.broadcast %c1_i32_14 : i32 to vector<32x512xi32>
      %23 = arith.cmpi eq, %10, %22 : vector<32x512xi32>
      %24 = arith.extui %23 : vector<32x512xi1> to vector<32x512xi32>
      %25 = arith.addi %21, %24 : vector<32x512xi32>
      %c1_15 = arith.constant 1 : index
      %c0_16 = arith.constant 0 : index
      %c0_17 = arith.constant 0 : index
      %26 = vector.load %arg3[%c1_15, %c0_16, %c0_17] : memref<4x32x512xi32, #tpu.memory_space<vmem>>, vector<1x32x512xi32>
      %27 = vector.shape_cast %26 : vector<1x32x512xi32> to vector<32x512xi32>
      %28 = vector.shape_cast %25 : vector<32x512xi32> to vector<1x32x512xi32>
      tpu.vector_store %arg3[%c1_15, %c0_16, %c0_17], %28 {strides = array<i32>} : memref<4x32x512xi32, #tpu.memory_space<vmem>>, vector<1x32x512xi32>,
      %c2 = arith.constant 2 : index
      %c0_18 = arith.constant 0 : index
      %c0_19 = arith.constant 0 : index
      %29 = vector.load %arg3[%c2, %c0_18, %c0_19] : memref<4x32x512xi32, #tpu.memory_space<vmem>>, vector<1x32x512xi32>
      %30 = vector.shape_cast %29 : vector<1x32x512xi32> to vector<32x512xi32>
      %c2_i32 = arith.constant 2 : i32
      %31 = vector.broadcast %c2_i32 : i32 to vector<32x512xi32>
      %32 = arith.cmpi eq, %10, %31 : vector<32x512xi32>
      %33 = arith.extui %32 : vector<32x512xi1> to vector<32x512xi32>
      %34 = arith.addi %30, %33 : vector<32x512xi32>
      %c2_20 = arith.constant 2 : index
      %c0_21 = arith.constant 0 : index
      %c0_22 = arith.constant 0 : index
      %35 = vector.load %arg3[%c2_20, %c0_21, %c0_22] : memref<4x32x512xi32, #tpu.memory_space<vmem>>, vector<1x32x512xi32>
      %36 = vector.shape_cast %35 : vector<1x32x512xi32> to vector<32x512xi32>
      %37 = vector.shape_cast %34 : vector<32x512xi32> to vector<1x32x512xi32>
      tpu.vector_store %arg3[%c2_20, %c0_21, %c0_22], %37 {strides = array<i32>} : memref<4x32x512xi32, #tpu.memory_space<vmem>>, vector<1x32x512xi32>,
      %c3 = arith.constant 3 : index
      %c0_23 = arith.constant 0 : index
      %c0_24 = arith.constant 0 : index
      %38 = vector.load %arg3[%c3, %c0_23, %c0_24] : memref<4x32x512xi32, #tpu.memory_space<vmem>>, vector<1x32x512xi32>
      %39 = vector.shape_cast %38 : vector<1x32x512xi32> to vector<32x512xi32>
      %c3_i32 = arith.constant 3 : i32
      %40 = vector.broadcast %c3_i32 : i32 to vector<32x512xi32>
      %41 = arith.cmpi eq, %10, %40 : vector<32x512xi32>
      %42 = arith.extui %41 : vector<32x512xi1> to vector<32x512xi32>
      %43 = arith.addi %39, %42 : vector<32x512xi32>
      %c3_25 = arith.constant 3 : index
      %c0_26 = arith.constant 0 : index
      %c0_27 = arith.constant 0 : index
      %44 = vector.load %arg3[%c3_25, %c0_26, %c0_27] : memref<4x32x512xi32, #tpu.memory_space<vmem>>, vector<1x32x512xi32>
      %45 = vector.shape_cast %44 : vector<1x32x512xi32> to vector<32x512xi32>
      %46 = vector.shape_cast %43 : vector<32x512xi32> to vector<1x32x512xi32>
      tpu.vector_store %arg3[%c3_25, %c0_26, %c0_27], %46 {strides = array<i32>} : memref<4x32x512xi32, #tpu.memory_space<vmem>>, vector<1x32x512xi32>,
    }
    %c16_i32_2 = arith.constant 16 : i32
    return
  }
  func.func @transform_0(%arg0: i32, %arg1: i32) -> (i32, i32) {
    %c1_i32 = arith.constant 1 : i32
    %0 = arith.muli %arg0, %c1_i32 : i32
    %1 = arith.addi %0, %arg1 : i32
    %c0_i32 = arith.constant 0 : i32
    %c0_i32_0 = arith.constant 0 : i32
    return %c0_i32, %1 : i32, i32
  }
  func.func @transform_1(%arg0: i32, %arg1: i32) -> (i32, i32, i32) {
    %c0_i32 = arith.constant 0 : i32
    %c0_i32_0 = arith.constant 0 : i32
    %c0_i32_1 = arith.constant 0 : i32
    return %arg0, %c0_i32, %c0_i32_0 : i32, i32, i32
  }
}

</mosaic_0001>

<bundles_post_ra>
// kernel: tpu_custom_call.1
= control target key start
LH: loop header
LB: loop body
LE: loop exit
PB: predicated region body
PF: predicated region fallthrough
CT: control target
= control target key end

     0   :  { %6 = vsyncpa [#allocation3], 0  ;;  %s814_s0 = inlined_call_operand.hbm [shape: s8[32,8192], index: 0, kind: input, shape index: {}]   ;;  %s815_s1 = inlined_call_operand.hbm [shape: s32[4,32,512], index: 1, kind: output, shape index: {}]  }
   0x1   :  { %7 = vsyncpa [#allocation4], 0  ;;  %s17_s8 = sshll.u32 %s814_s0, 4  ;;  %s553_s9 = smov [#allocation2]   ;;  %s18_s8 = int_to_ptr.hbm [resolvable:$true] %s17_s8 }
   0x2   :  { %s19_s10 = sshll.u32 %s553_s9, 4  ;;  %s20_s10 = int_to_ptr.vmem [resolvable:$true] %s19_s10 }
   0x3   :  { %22 = dma.hbm_to_vmem [thread:$0]  %s18_s8, 8192, %s20_s10, [#allocation3]  }
   0x4   :  { %545 = dma.done.wait [#allocation3], 8192  }
   0x5   :  { %546 = vsyncadd [#allocation3], 4294959104  ;;  %v554_v0 = vmov 0   ;;  %s636_s0 = smov 0  }
   0x6   :  { %33 = vst [vmem:[#allocation5] sm:$0xff] %v554_v0 }
   0x7   :  { %34 = vst [vmem:[#allocation5 + $0x8] sm:$0xff] %v554_v0 }
   0x8   :  { %35 = vst [vmem:[#allocation5 + $0x10] sm:$0xff] %v554_v0 }
   0x9   :  { %36 = vst [vmem:[#allocation5 + $0x18] sm:$0xff] %v554_v0 }
   0xa   :  { %37 = vst [vmem:[#allocation5 + $0x20] sm:$0xff] %v554_v0 }
   0xb   :  { %38 = vst [vmem:[#allocation5 + $0x28] sm:$0xff] %v554_v0 }
   0xc   :  { %39 = vst [vmem:[#allocation5 + $0x30] sm:$0xff] %v554_v0 }
   0xd   :  { %40 = vst [vmem:[#allocation5 + $0x38] sm:$0xff] %v554_v0 }
   0xe   :  { %41 = vst [vmem:[#allocation5 + $0x40] sm:$0xff] %v554_v0 }
   0xf   :  { %42 = vst [vmem:[#allocation5 + $0x48] sm:$0xff] %v554_v0 }
  0x10   :  { %43 = vst [vmem:[#allocation5 + $0x50] sm:$0xff] %v554_v0 }
  0x11   :  { %44 = vst [vmem:[#allocation5 + $0x58] sm:$0xff] %v554_v0 }
  0x12   :  { %45 = vst [vmem:[#allocation5 + $0x60] sm:$0xff] %v554_v0 }
  0x13   :  { %46 = vst [vmem:[#allocation5 + $0x68] sm:$0xff] %v554_v0 }
  0x14   :  { %47 = vst [vmem:[#allocation5 + $0x70] sm:$0xff] %v554_v0 }
  0x15   :  { %48 = vst [vmem:[#allocation5 + $0x78] sm:$0xff] %v554_v0 }
  0x16   :  { %49 = vst [vmem:[#allocation5 + $0x80] sm:$0xff] %v554_v0 }
  0x17   :  { %50 = vst [vmem:[#allocation5 + $0x88] sm:$0xff] %v554_v0 }
  0x18   :  { %51 = vst [vmem:[#allocation5 + $0x90] sm:$0xff] %v554_v0 }
  0x19   :  { %52 = vst [vmem:[#allocation5 + $0x98] sm:$0xff] %v554_v0 }
  0x1a   :  { %53 = vst [vmem:[#allocation5 + $0xa0] sm:$0xff] %v554_v0 }
  0x1b   :  { %54 = vst [vmem:[#allocation5 + $0xa8] sm:$0xff] %v554_v0 }
  0x1c   :  { %55 = vst [vmem:[#allocation5 + $0xb0] sm:$0xff] %v554_v0 }
  0x1d   :  { %56 = vst [vmem:[#allocation5 + $0xb8] sm:$0xff] %v554_v0 }
  0x1e   :  { %57 = vst [vmem:[#allocation5 + $0xc0] sm:$0xff] %v554_v0 }
  0x1f   :  { %58 = vst [vmem:[#allocation5 + $0xc8] sm:$0xff] %v554_v0 }
  0x20   :  { %59 = vst [vmem:[#allocation5 + $0xd0] sm:$0xff] %v554_v0 }
  0x21   :  { %60 = vst [vmem:[#allocation5 + $0xd8] sm:$0xff] %v554_v0 }
  0x22   :  { %61 = vst [vmem:[#allocation5 + $0xe0] sm:$0xff] %v554_v0 }
  0x23   :  { %62 = vst [vmem:[#allocation5 + $0xe8] sm:$0xff] %v554_v0 }
  0x24   :  { %63 = vst [vmem:[#allocation5 + $0xf0] sm:$0xff] %v554_v0 }
  0x25   :  { %64 = vst [vmem:[#allocation5 + $0xf8] sm:$0xff] %v554_v0 }
  0x26   :  { %65 = vst [vmem:[#allocation5 + $0x100] sm:$0xff] %v554_v0 }
  0x27   :  { %66 = vst [vmem:[#allocation5 + $0x108] sm:$0xff] %v554_v0 }
  0x28   :  { %67 = vst [vmem:[#allocation5 + $0x110] sm:$0xff] %v554_v0 }
  0x29   :  { %68 = vst [vmem:[#allocation5 + $0x118] sm:$0xff] %v554_v0 }
  0x2a   :  { %69 = vst [vmem:[#allocation5 + $0x120] sm:$0xff] %v554_v0 }
  0x2b   :  { %70 = vst [vmem:[#allocation5 + $0x128] sm:$0xff] %v554_v0 }
  0x2c   :  { %71 = vst [vmem:[#allocation5 + $0x130] sm:$0xff] %v554_v0 }
  0x2d   :  { %72 = vst [vmem:[#allocation5 + $0x138] sm:$0xff] %v554_v0 }
  0x2e   :  { %73 = vst [vmem:[#allocation5 + $0x140] sm:$0xff] %v554_v0 }
  0x2f   :  { %74 = vst [vmem:[#allocation5 + $0x148] sm:$0xff] %v554_v0 }
  0x30   :  { %75 = vst [vmem:[#allocation5 + $0x150] sm:$0xff] %v554_v0 }
  0x31   :  { %76 = vst [vmem:[#allocation5 + $0x158] sm:$0xff] %v554_v0 }
  0x32   :  { %77 = vst [vmem:[#allocation5 + $0x160] sm:$0xff] %v554_v0 }
  0x33   :  { %78 = vst [vmem:[#allocation5 + $0x168] sm:$0xff] %v554_v0 }
  0x34   :  { %79 = vst [vmem:[#allocation5 + $0x170] sm:$0xff] %v554_v0 }
  0x35   :  { %80 = vst [vmem:[#allocation5 + $0x178] sm:$0xff] %v554_v0 }
  0x36   :  { %81 = vst [vmem:[#allocation5 + $0x180] sm:$0xff] %v554_v0 }
  0x37   :  { %82 = vst [vmem:[#allocation5 + $0x188] sm:$0xff] %v554_v0 }
  0x38   :  { %83 = vst [vmem:[#allocation5 + $0x190] sm:$0xff] %v554_v0 }
  0x39   :  { %84 = vst [vmem:[#allocation5 + $0x198] sm:$0xff] %v554_v0 }
  0x3a   :  { %85 = vst [vmem:[#allocation5 + $0x1a0] sm:$0xff] %v554_v0 }
  0x3b   :  { %86 = vst [vmem:[#allocation5 + $0x1a8] sm:$0xff] %v554_v0 }
  0x3c   :  { %87 = vst [vmem:[#allocation5 + $0x1b0] sm:$0xff] %v554_v0 }
  0x3d   :  { %88 = vst [vmem:[#allocation5 + $0x1b8] sm:$0xff] %v554_v0 }
  0x3e   :  { %89 = vst [vmem:[#allocation5 + $0x1c0] sm:$0xff] %v554_v0 }
  0x3f   :  { %90 = vst [vmem:[#allocation5 + $0x1c8] sm:$0xff] %v554_v0 }
  0x40   :  { %91 = vst [vmem:[#allocation5 + $0x1d0] sm:$0xff] %v554_v0 }
  0x41   :  { %92 = vst [vmem:[#allocation5 + $0x1d8] sm:$0xff] %v554_v0 }
  0x42   :  { %93 = vst [vmem:[#allocation5 + $0x1e0] sm:$0xff] %v554_v0 }
  0x43   :  { %94 = vst [vmem:[#allocation5 + $0x1e8] sm:$0xff] %v554_v0 }
  0x44   :  { %95 = vst [vmem:[#allocation5 + $0x1f0] sm:$0xff] %v554_v0 }
  0x45   :  { %96 = vst [vmem:[#allocation5 + $0x1f8] sm:$0xff] %v554_v0 }
  0x46 LB: > { %s477_s11 = sshll.u32 %s551_s0, 9  ;;  %v128_v9 = vld [vmem:[#allocation5] sm:$0xff]  ;;  %v129_v10 = vld [vmem:[#allocation5 + $0x8] sm:$0xff]  ;;  %v130_v11 = vld [vmem:[#allocation5 + $0x10] sm:$0xff]  ;;  %v555_v17 = vmov 0   ;;  %s102_s0 = sadd.s32 1, %s551_s0   ;;  %s551_s0 = sphi %s636_s0, %s102_s0  }
  0x47   : > { %s104_s12 = sshra.s32 %s477_s11, 7  ;;  %v131_v16 = vld [vmem:[#allocation5 + $0x18] sm:$0xff]  ;;  %v132_v21 = vld [vmem:[#allocation5 + $0x20] sm:$0xff]  ;;  %v133_v26 = vld [vmem:[#allocation5 + $0x28] sm:$0xff]  ;;  %p99_p0 = scmp.ge.s32.totalorder %s102_s0, 16  }
  0x48   : > { %s478_s13 = sshll.u32 %s104_s12, 3  ;;  %v134_v27 = vld [vmem:[#allocation5 + $0x30] sm:$0xff]  ;;  %v135_v30 = vld [vmem:[#allocation5 + $0x38] sm:$0xff]  ;;  %v136_v39 = vld [vmem:[#allocation5 + $0x40] sm:$0xff]  ;;  %s457_s17 = sshll.u32 (%p99_p0), %s815_s1, 4  ;;  %s458_s17 = int_to_ptr.hbm [resolvable:$true] %s457_s17 }
  0x49   : > { %s107_s14 = scalar_lea.vmem [#allocation2], %s478_s13  ;;  %v137_v43 = vld [vmem:[#allocation5 + $0x48] sm:$0xff]  ;;  %v138_v44 = vld [vmem:[#allocation5 + $0x50] sm:$0xff]  ;;  %v139_v45 = vld [vmem:[#allocation5 + $0x58] sm:$0xff]  ;;  %s556_s18 = smov (%p99_p0), [#allocation5]  }
  0x4a   : > { %v108_v1 = vld [vmem:[%s107_s14] sm:$0xff]  ;;  %v109_v2 = vld [vmem:[%s107_s14 + $0x8] sm:$0xff]  ;;  %v110_v3 = vld [vmem:[%s107_s14 + $0x10] sm:$0xff]  ;;  %s455_s19 = sshll.u32 (%p99_p0), %s556_s18, 4  ;;  %s557_s20 = smov (%p99_p0), 512   ;;  %s456_s19 = int_to_ptr.vmem [resolvable:$true] %s455_s19 }
  0x4b   : > { %v642_v4 = vunpack.c.0.s8 %v108_v1  ;;  %v644_v5 = vunpack.c.0.s8 %v109_v2  ;;  %v646_v6 = vunpack.c.0.s8 %v110_v3  ;;  %v648_v7 = vld [vmem:[%s107_s14 + $0x18] sm:$0xff]  ;;  %v650_v8 = vunpack.c.1.s8 %v108_v1  ;;  %v140_v54 = vld [vmem:[#allocation5 + $0x60] sm:$0xff]  ;;  %v141_v58 = vld [vmem:[#allocation5 + $0x68] sm:$0xff]  ;;  %s558_s21 = smov (%p99_p0), 32  }
  0x4c   : > { %v653_v12 = vunpack.c.0.s8 %v648_v7  ;;  %v655_v13 = vunpack.c.1.s8 %v109_v2  ;;  %v657_v14 = vunpack.c.1.s8 %v110_v3  ;;  %v660_v15 = vunpack.c.1.s8 %v648_v7  ;;  %v142_v60 = vld [vmem:[#allocation5 + $0x70] sm:$0xff] }
  0x4d   : > { %vm144_vm0 = vcmp.eq.s32.totalorder %v642_v4, 0  ;;  %vm145_vm1 = vcmp.eq.s32.totalorder %v644_v5, 0  ;;  %vm146_vm2 = vcmp.eq.s32.totalorder %v646_v6, 0  ;;  %vm148_vm3 = vcmp.eq.s32.totalorder %v650_v8, 0 }
  0x4e   : > { %v160_v18 = vsel %vm144_vm0, 1, %v555_v17  ;;  %v161_v19 = vsel %vm145_vm1, 1, %v555_v17  ;;  %v162_v20 = vsel %vm146_vm2, 1, %v555_v17  ;;  %vm147_vm4 = vcmp.eq.s32.totalorder %v653_v12, 0 }
  0x4f   : > { %v176_v22 = vadd.s32 %v160_v18, %v128_v9  ;;  %v177_v23 = vadd.s32 %v161_v19, %v129_v10  ;;  %v178_v24 = vadd.s32 %v162_v20, %v130_v11  ;;  %v163_v25 = vsel %vm147_vm4, 1, %v555_v17  ;;  %v210_v11 = vld [vmem:[#allocation5 + $0x88] sm:$0xff]  ;;  %v211_v19 = vld [vmem:[#allocation5 + $0x90] sm:$0xff] }
  0x50   : > { %v179_v28 = vadd.s32 %v163_v25, %v131_v16  ;;  %v164_v29 = vsel %vm148_vm3, 1, %v555_v17  ;;  %vm149_vm5 = vcmp.eq.s32.totalorder %v655_v13, 0  ;;  %vm150_vm6 = vcmp.eq.s32.totalorder %v657_v14, 0  ;;  %v213_v25 = vld [vmem:[#allocation5 + $0xa0] sm:$0xff] }
  0x51   : > { %192 = vst [vmem:[#allocation5] sm:$0xff] %v176_v22  ;;  %v180_v31 = vadd.s32 %v164_v29, %v132_v21  ;;  %v165_v32 = vsel %vm149_vm5, 1, %v555_v17  ;;  %v166_v33 = vsel %vm150_vm6, 1, %v555_v17  ;;  %vm151_vm7 = vcmp.eq.s32.totalorder %v660_v15, 0  ;;  %v212_v22 = vld [vmem:[#allocation5 + $0x98] sm:$0xff] }
  0x52   : > { %193 = vst [vmem:[#allocation5 + $0x8] sm:$0xff] %v177_v23  ;;  %v181_v34 = vadd.s32 %v165_v32, %v133_v26  ;;  %v182_v35 = vadd.s32 %v166_v33, %v134_v27  ;;  %v167_v36 = vsel %vm151_vm7, 1, %v555_v17  ;;  %v678_v37 = vunpack.c.2.s8 %v108_v1 }
  0x53   : > { %194 = vst [vmem:[#allocation5 + $0x10] sm:$0xff] %v178_v24  ;;  %v183_v38 = vadd.s32 %v167_v36, %v135_v30  ;;  %v680_v40 = vunpack.c.2.s8 %v109_v2  ;;  %v682_v41 = vunpack.c.2.s8 %v110_v3  ;;  %v685_v42 = vunpack.c.2.s8 %v648_v7 }
  0x54   : > { %195 = vst [vmem:[#allocation5 + $0x18] sm:$0xff] %v179_v28  ;;  %vm152_vm8 = vcmp.eq.s32.totalorder %v678_v37, 0  ;;  %v688_v46 = vunpack.c.3.s8 %v108_v1  ;;  %v690_v47 = vunpack.c.3.s8 %v109_v2  ;;  %v692_v48 = vunpack.c.3.s8 %v110_v3  ;;  %v143_v1 = vld [vmem:[#allocation5 + $0x78] sm:$0xff]  ;;  %v209_v3 = vld [vmem:[#allocation5 + $0x80] sm:$0xff]  ;;  %v214_v28 = vld [vmem:[#allocation5 + $0xa8] sm:$0xff] }
  0x55   : > { %196 = vst [vmem:[#allocation5 + $0x20] sm:$0xff] %v180_v31  ;;  %v168_v49 = vsel %vm152_vm8, 1, %v555_v17  ;;  %vm153_vm9 = vcmp.eq.s32.totalorder %v680_v40, 0  ;;  %vm154_vm10 = vcmp.eq.s32.totalorder %v682_v41, 0  ;;  %vm155_vm11 = vcmp.eq.s32.totalorder %v685_v42, 0  ;;  %v215_v31 = vld [vmem:[#allocation5 + $0xb0] sm:$0xff] }
  0x56   : > { %197 = vst [vmem:[#allocation5 + $0x28] sm:$0xff] %v181_v34  ;;  %v184_v50 = vadd.s32 %v168_v49, %v136_v39  ;;  %v169_v51 = vsel %vm153_vm9, 1, %v555_v17  ;;  %v170_v52 = vsel %vm154_vm10, 1, %v555_v17  ;;  %v171_v53 = vsel %vm155_vm11, 1, %v555_v17  ;;  %v216_v34 = vld [vmem:[#allocation5 + $0xb8] sm:$0xff] }
  0x57   : > { %198 = vst [vmem:[#allocation5 + $0x30] sm:$0xff] %v182_v35  ;;  %v185_v55 = vadd.s32 %v169_v51, %v137_v43  ;;  %v186_v56 = vadd.s32 %v170_v52, %v138_v44  ;;  %v187_v57 = vadd.s32 %v171_v53, %v139_v45  ;;  %vm156_vm12 = vcmp.eq.s32.totalorder %v688_v46, 0  ;;  %v218_v44 = vld [vmem:[#allocation5 + $0xc8] sm:$0xff]  ;;  %v220_v53 = vld [vmem:[#allocation5 + $0xd8] sm:$0xff] }
  0x58   : > { %199 = vst [vmem:[#allocation5 + $0x38] sm:$0xff] %v183_v38  ;;  %v172_v59 = vsel %vm156_vm12, 1, %v555_v17  ;;  %vm157_vm13 = vcmp.eq.s32.totalorder %v690_v47, 0  ;;  %vm158_vm14 = vcmp.eq.s32.totalorder %v692_v48, 0  ;;  %v706_v61 = vunpack.c.3.s8 %v648_v7  ;;  %v217_v38 = vld [vmem:[#allocation5 + $0xc0] sm:$0xff] }
  0x59   : > { %200 = vst [vmem:[#allocation5 + $0x40] sm:$0xff] %v184_v50  ;;  %v188_v62 = vadd.s32 %v172_v59, %v140_v54  ;;  %v173_v63 = vsel %vm157_vm13, 1, %v555_v17  ;;  %v174_v0 = vsel %vm158_vm14, 1, %v555_v17  ;;  %vm225_vm15 = vcmp.eq.s32.totalorder %v642_v4, 1  ;;  %v219_v50 = vld [vmem:[#allocation5 + $0xd0] sm:$0xff]  ;;  %v222_v59 = vld [vmem:[#allocation5 + $0xe8] sm:$0xff] }
  0x5a   : > { %201 = vst [vmem:[#allocation5 + $0x48] sm:$0xff] %v185_v55  ;;  %v189_v2 = vadd.s32 %v173_v63, %v141_v58  ;;  %vm159_vm0 = vcmp.eq.s32.totalorder %v706_v61, 0  ;;  %v241_v9 = vsel %vm225_vm15, 1, %v555_v17  ;;  %v190_v10 = vadd.s32 %v174_v0, %v142_v60  ;;  %v223_v63 = vld [vmem:[#allocation5 + $0xf0] sm:$0xff] }
  0x5b   : > { %202 = vst [vmem:[#allocation5 + $0x50] sm:$0xff] %v186_v56  ;;  %v175_v7 = vsel %vm159_vm0, 1, %v555_v17  ;;  %vm226_vm1 = vcmp.eq.s32.totalorder %v644_v5, 1  ;;  %vm227_vm2 = vcmp.eq.s32.totalorder %v646_v6, 1  ;;  %vm228_vm3 = vcmp.eq.s32.totalorder %v653_v12, 1  ;;  %v221_v56 = vld [vmem:[#allocation5 + $0xe0] sm:$0xff] }
  0x5c   : > { %203 = vst [vmem:[#allocation5 + $0x58] sm:$0xff] %v187_v57  ;;  %v191_v16 = vadd.s32 %v175_v7, %v143_v1  ;;  %v242_v18 = vsel %vm226_vm1, 1, %v555_v17  ;;  %v243_v20 = vsel %vm227_vm2, 1, %v555_v17  ;;  %v257_v21 = vadd.s32 %v241_v9, %v209_v3 }
  0x5d   : > { %204 = vst [vmem:[#allocation5 + $0x60] sm:$0xff] %v188_v62  ;;  %v244_v23 = vsel %vm228_vm3, 1, %v555_v17  ;;  %vm229_vm4 = vcmp.eq.s32.totalorder %v650_v8, 1  ;;  %v258_v24 = vadd.s32 %v242_v18, %v210_v11  ;;  %vm230_vm5 = vcmp.eq.s32.totalorder %v655_v13, 1 }
  0x5e   : > { %205 = vst [vmem:[#allocation5 + $0x68] sm:$0xff] %v189_v2  ;;  %v245_v26 = vsel %vm229_vm4, 1, %v555_v17  ;;  %vm231_vm6 = vcmp.eq.s32.totalorder %v657_v14, 1  ;;  %v259_v27 = vadd.s32 %v243_v20, %v211_v19  ;;  %v246_v29 = vsel %vm230_vm5, 1, %v555_v17  ;;  %v224_v2 = vld [vmem:[#allocation5 + $0xf8] sm:$0xff]  ;;  %v292_v20 = vld [vmem:[#allocation5 + $0x110] sm:$0xff] }
  0x5f   : > { %206 = vst [vmem:[#allocation5 + $0x70] sm:$0xff] %v190_v10  ;;  %vm232_vm7 = vcmp.eq.s32.totalorder %v660_v15, 1  ;;  %v260_v30 = vadd.s32 %v244_v23, %v212_v22  ;;  %v247_v32 = vsel %vm231_vm6, 1, %v555_v17  ;;  %vm233_vm8 = vcmp.eq.s32.totalorder %v678_v37, 1  ;;  %v290_v10 = vld [vmem:[#allocation5 + $0x100] sm:$0xff]  ;;  %v293_v23 = vld [vmem:[#allocation5 + $0x118] sm:$0xff] }
  0x60   : > { %207 = vst [vmem:[#allocation5 + $0x78] sm:$0xff] %v191_v16  ;;  %v261_v33 = vadd.s32 %v245_v26, %v213_v25  ;;  %v248_v35 = vsel %vm232_vm7, 1, %v555_v17  ;;  %vm234_vm9 = vcmp.eq.s32.totalorder %v680_v40, 1  ;;  %vm235_vm10 = vcmp.eq.s32.totalorder %v682_v41, 1  ;;  %v291_v16 = vld [vmem:[#allocation5 + $0x108] sm:$0xff]  ;;  %v294_v26 = vld [vmem:[#allocation5 + $0x120] sm:$0xff] }
  0x61   : > { %273 = vst [vmem:[#allocation5 + $0x80] sm:$0xff] %v257_v21  ;;  %v262_v36 = vadd.s32 %v246_v29, %v214_v28  ;;  %v249_v39 = vsel %vm233_vm8, 1, %v555_v17  ;;  %vm236_vm11 = vcmp.eq.s32.totalorder %v685_v42, 1  ;;  %v263_v43 = vadd.s32 %v247_v32, %v215_v31  ;;  %v295_v29 = vld [vmem:[#allocation5 + $0x128] sm:$0xff]  ;;  %v296_v32 = vld [vmem:[#allocation5 + $0x130] sm:$0xff] }
  0x62   : > { %274 = vst [vmem:[#allocation5 + $0x88] sm:$0xff] %v258_v24  ;;  %v250_v45 = vsel %vm234_vm9, 1, %v555_v17  ;;  %vm237_vm12 = vcmp.eq.s32.totalorder %v688_v46, 1  ;;  %v264_v49 = vadd.s32 %v248_v35, %v216_v34  ;;  %v251_v51 = vsel %vm235_vm10, 1, %v555_v17  ;;  %v297_v35 = vld [vmem:[#allocation5 + $0x138] sm:$0xff] }
  0x63   : > { %275 = vst [vmem:[#allocation5 + $0x90] sm:$0xff] %v259_v27  ;;  %vm238_vm13 = vcmp.eq.s32.totalorder %v690_v47, 1  ;;  %v265_v52 = vadd.s32 %v249_v39, %v217_v38  ;;  %v252_v54 = vsel %vm236_vm11, 1, %v555_v17  ;;  %vm239_vm14 = vcmp.eq.s32.totalorder %v692_v48, 1  ;;  %v298_v39 = vld [vmem:[#allocation5 + $0x140] sm:$0xff] }
  0x64   : > { %276 = vst [vmem:[#allocation5 + $0x98] sm:$0xff] %v260_v30  ;;  %v266_v55 = vadd.s32 %v250_v45, %v218_v44  ;;  %v253_v57 = vsel %vm237_vm12, 1, %v555_v17  ;;  %vm240_vm15 = vcmp.eq.s32.totalorder %v706_v61, 1  ;;  %v267_v58 = vadd.s32 %v251_v51, %v219_v50  ;;  %v299_v45 = vld [vmem:[#allocation5 + $0x148] sm:$0xff]  ;;  %v300_v51 = vld [vmem:[#allocation5 + $0x150] sm:$0xff] }
  0x65   : > { %277 = vst [vmem:[#allocation5 + $0xa0] sm:$0xff] %v261_v33  ;;  %v254_v60 = vsel %vm238_vm13, 1, %v555_v17  ;;  %vm306_vm0 = vcmp.eq.s32.totalorder %v642_v4, 2  ;;  %v268_v62 = vadd.s32 %v252_v54, %v220_v53  ;;  %v255_v0 = vsel %vm239_vm14, 1, %v555_v17  ;;  %v301_v54 = vld [vmem:[#allocation5 + $0x158] sm:$0xff] }
  0x66   : > { %278 = vst [vmem:[#allocation5 + $0xa8] sm:$0xff] %v262_v36  ;;  %vm307_vm1 = vcmp.eq.s32.totalorder %v644_v5, 2  ;;  %v269_v1 = vadd.s32 %v253_v57, %v221_v56  ;;  %v256_v3 = vsel %vm240_vm15, 1, %v555_v17  ;;  %vm308_vm2 = vcmp.eq.s32.totalorder %v646_v6, 2  ;;  %v302_v57 = vld [vmem:[#allocation5 + $0x160] sm:$0xff] }
  0x67   : > { %279 = vst [vmem:[#allocation5 + $0xb0] sm:$0xff] %v263_v43  ;;  %v270_v9 = vadd.s32 %v254_v60, %v222_v59  ;;  %v322_v7 = vsel %vm306_vm0, 1, %v555_v17  ;;  %vm309_vm3 = vcmp.eq.s32.totalorder %v653_v12, 2  ;;  %v271_v11 = vadd.s32 %v255_v0, %v223_v63  ;;  %v303_v60 = vld [vmem:[#allocation5 + $0x168] sm:$0xff]  ;;  %v304_v0 = vld [vmem:[#allocation5 + $0x170] sm:$0xff] }
  0x68   : > { %280 = vst [vmem:[#allocation5 + $0xb8] sm:$0xff] %v264_v49  ;;  %v323_v18 = vsel %vm307_vm1, 1, %v555_v17  ;;  %vm310_vm4 = vcmp.eq.s32.totalorder %v650_v8, 2  ;;  %v272_v19 = vadd.s32 %v256_v3, %v224_v2  ;;  %v324_v21 = vsel %vm308_vm2, 1, %v555_v17  ;;  %v305_v3 = vld [vmem:[#allocation5 + $0x178] sm:$0xff] }
  0x69   : > { %281 = vst [vmem:[#allocation5 + $0xc0] sm:$0xff] %v265_v52  ;;  %vm311_vm5 = vcmp.eq.s32.totalorder %v655_v13, 2  ;;  %v338_v22 = vadd.s32 %v322_v7, %v290_v10  ;;  %v325_v24 = vsel %vm309_vm3, 1, %v555_v17  ;;  %vm312_vm6 = vcmp.eq.s32.totalorder %v657_v14, 2  ;;  %v371_v7 = vld [vmem:[#allocation5 + $0x180] sm:$0xff] }
  0x6a   : > { %282 = vst [vmem:[#allocation5 + $0xc8] sm:$0xff] %v266_v55  ;;  %v339_v25 = vadd.s32 %v323_v18, %v291_v16  ;;  %v326_v27 = vsel %vm310_vm4, 1, %v555_v17  ;;  %vm313_vm7 = vcmp.eq.s32.totalorder %v660_v15, 2  ;;  %v340_v28 = vadd.s32 %v324_v21, %v292_v20  ;;  %v372_v16 = vld [vmem:[#allocation5 + $0x188] sm:$0xff]  ;;  %v374_v21 = vld [vmem:[#allocation5 + $0x198] sm:$0xff] }
  0x6b   : > { %283 = vst [vmem:[#allocation5 + $0xd0] sm:$0xff] %v267_v58  ;;  %v327_v30 = vsel %vm311_vm5, 1, %v555_v17  ;;  %vm314_vm8 = vcmp.eq.s32.totalorder %v678_v37, 2  ;;  %v341_v31 = vadd.s32 %v325_v24, %v293_v23  ;;  %v328_v33 = vsel %vm312_vm6, 1, %v555_v17  ;;  %v375_v23 = vld [vmem:[#allocation5 + $0x1a0] sm:$0xff] }
  0x6c   : > { %284 = vst [vmem:[#allocation5 + $0xd8] sm:$0xff] %v268_v62  ;;  %vm315_vm9 = vcmp.eq.s32.totalorder %v680_v40, 2  ;;  %v342_v34 = vadd.s32 %v326_v27, %v294_v26  ;;  %v329_v36 = vsel %vm313_vm7, 1, %v555_v17  ;;  %vm316_vm10 = vcmp.eq.s32.totalorder %v682_v41, 2  ;;  %v377_v27 = vld [vmem:[#allocation5 + $0x1b0] sm:$0xff] }
  0x6d   : > { %285 = vst [vmem:[#allocation5 + $0xe0] sm:$0xff] %v269_v1  ;;  %v343_v38 = vadd.s32 %v327_v30, %v295_v29  ;;  %v330_v43 = vsel %vm314_vm8, 1, %v555_v17  ;;  %vm317_vm11 = vcmp.eq.s32.totalorder %v685_v42, 2  ;;  %v344_v44 = vadd.s32 %v328_v33, %v296_v32  ;;  %v378_v29 = vld [vmem:[#allocation5 + $0x1b8] sm:$0xff]  ;;  %v380_v33 = vld [vmem:[#allocation5 + $0x1c8] sm:$0xff] }
  0x6e   : > { %286 = vst [vmem:[#allocation5 + $0xe8] sm:$0xff] %v270_v9  ;;  %v331_v49 = vsel %vm315_vm9, 1, %v555_v17  ;;  %vm318_vm12 = vcmp.eq.s32.totalorder %v688_v46, 2  ;;  %v345_v50 = vadd.s32 %v329_v36, %v297_v35  ;;  %v332_v52 = vsel %vm316_vm10, 1, %v555_v17  ;;  %v381_v35 = vld [vmem:[#allocation5 + $0x1d0] sm:$0xff] }
  0x6f   : > { %287 = vst [vmem:[#allocation5 + $0xf0] sm:$0xff] %v271_v11  ;;  %vm319_vm13 = vcmp.eq.s32.totalorder %v690_v47, 2  ;;  %v346_v53 = vadd.s32 %v330_v43, %v298_v39  ;;  %v333_v55 = vsel %vm317_vm11, 1, %v555_v17  ;;  %vm320_vm14 = vcmp.eq.s32.totalorder %v692_v48, 2  ;;  %v383_v43 = vld [vmem:[#allocation5 + $0x1e0] sm:$0xff] }
  0x70   : > { %288 = vst [vmem:[#allocation5 + $0xf8] sm:$0xff] %v272_v19  ;;  %v347_v56 = vadd.s32 %v331_v49, %v299_v45  ;;  %v334_v58 = vsel %vm318_vm12, 1, %v555_v17  ;;  %vm321_vm15 = vcmp.eq.s32.totalorder %v706_v61, 2  ;;  %v348_v59 = vadd.s32 %v332_v52, %v300_v51  ;;  %v373_v19 = vld [vmem:[#allocation5 + $0x190] sm:$0xff]  ;;  %v384_v45 = vld [vmem:[#allocation5 + $0x1e8] sm:$0xff] }
  0x71   : > { %354 = vst [vmem:[#allocation5 + $0x100] sm:$0xff] %v338_v22  ;;  %v335_v62 = vsel %vm319_vm13, 1, %v555_v17  ;;  %vm387_vm0 = vcmp.eq.s32.totalorder %v642_v4, 3  ;;  %v349_v63 = vadd.s32 %v333_v55, %v301_v54  ;;  %v336_v1 = vsel %vm320_vm14, 1, %v555_v17 }
  0x72   : > { %355 = vst [vmem:[#allocation5 + $0x108] sm:$0xff] %v339_v25  ;;  %vm388_vm1 = vcmp.eq.s32.totalorder %v644_v5, 3  ;;  %v350_v2 = vadd.s32 %v334_v58, %v302_v57  ;;  %v337_v9 = vsel %vm321_vm15, 1, %v555_v17  ;;  %vm389_vm2 = vcmp.eq.s32.totalorder %v646_v6, 3  ;;  %v376_v25 = vld [vmem:[#allocation5 + $0x1a8] sm:$0xff] }
  0x73   : > { %356 = vst [vmem:[#allocation5 + $0x110] sm:$0xff] %v340_v28  ;;  %v351_v10 = vadd.s32 %v335_v62, %v303_v60  ;;  %v403_v11 = vsel %vm387_vm0, 1, %v555_v17  ;;  %vm390_vm3 = vcmp.eq.s32.totalorder %v653_v12, 3  ;;  %v352_v4 = vadd.s32 %v336_v1, %v304_v0 }
  0x74   : > { %357 = vst [vmem:[#allocation5 + $0x118] sm:$0xff] %v341_v31  ;;  %v404_v18 = vsel %vm388_vm1, 1, %v555_v17  ;;  %vm391_vm4 = vcmp.eq.s32.totalorder %v650_v8, 3  ;;  %v353_v5 = vadd.s32 %v337_v9, %v305_v3  ;;  %v405_v20 = vsel %vm389_vm2, 1, %v555_v17  ;;  %v379_v31 = vld [vmem:[#allocation5 + $0x1c0] sm:$0xff] }
  0x75   : > { %358 = vst [vmem:[#allocation5 + $0x120] sm:$0xff] %v342_v34  ;;  %vm392_vm5 = vcmp.eq.s32.totalorder %v655_v13, 3  ;;  %v419_v6 = vadd.s32 %v403_v11, %v371_v7  ;;  %v406_v22 = vsel %vm390_vm3, 1, %v555_v17  ;;  %vm393_vm6 = vcmp.eq.s32.totalorder %v657_v14, 3 }
  0x76   : > { %359 = vst [vmem:[#allocation5 + $0x128] sm:$0xff] %v343_v38  ;;  %v420_v12 = vadd.s32 %v404_v18, %v372_v16  ;;  %v407_v24 = vsel %vm391_vm4, 1, %v555_v17  ;;  %vm394_vm7 = vcmp.eq.s32.totalorder %v660_v15, 3  ;;  %v421_v8 = vadd.s32 %v405_v20, %v373_v19  ;;  %v382_v38 = vld [vmem:[#allocation5 + $0x1d8] sm:$0xff] }
  0x77   : > { %360 = vst [vmem:[#allocation5 + $0x130] sm:$0xff] %v344_v44  ;;  %v408_v26 = vsel %vm392_vm5, 1, %v555_v17  ;;  %vm395_vm8 = vcmp.eq.s32.totalorder %v678_v37, 3  ;;  %v422_v13 = vadd.s32 %v406_v22, %v374_v21  ;;  %v409_v28 = vsel %vm393_vm6, 1, %v555_v17 }
  0x78   : > { %361 = vst [vmem:[#allocation5 + $0x138] sm:$0xff] %v345_v50  ;;  %vm396_vm9 = vcmp.eq.s32.totalorder %v680_v40, 3  ;;  %v423_v14 = vadd.s32 %v407_v24, %v375_v23  ;;  %v410_v30 = vsel %vm394_vm7, 1, %v555_v17  ;;  %vm397_vm10 = vcmp.eq.s32.totalorder %v682_v41, 3  ;;  %v385_v50 = vld [vmem:[#allocation5 + $0x1f0] sm:$0xff] }
  0x79   : > { %362 = vst [vmem:[#allocation5 + $0x140] sm:$0xff] %v346_v53  ;;  %v424_v15 = vadd.s32 %v408_v26, %v376_v25  ;;  %v411_v32 = vsel %vm395_vm8, 1, %v555_v17  ;;  %vm398_vm11 = vcmp.eq.s32.totalorder %v685_v42, 3  ;;  %v425_v37 = vadd.s32 %v409_v28, %v377_v27 }
  0x7a   : > { %363 = vst [vmem:[#allocation5 + $0x148] sm:$0xff] %v347_v56  ;;  %v412_v34 = vsel %vm396_vm9, 1, %v555_v17  ;;  %vm399_vm12 = vcmp.eq.s32.totalorder %v688_v46, 3  ;;  %v426_v40 = vadd.s32 %v410_v30, %v378_v29  ;;  %v413_v36 = vsel %vm397_vm10, 1, %v555_v17 }
  0x7b   : > { %364 = vst [vmem:[#allocation5 + $0x150] sm:$0xff] %v348_v59  ;;  %vm400_vm13 = vcmp.eq.s32.totalorder %v690_v47, 3  ;;  %v427_v41 = vadd.s32 %v411_v32, %v379_v31  ;;  %v414_v39 = vsel %vm398_vm11, 1, %v555_v17  ;;  %vm401_vm14 = vcmp.eq.s32.totalorder %v692_v48, 3  ;;  %v386_v48 = vld [vmem:[#allocation5 + $0x1f8] sm:$0xff] }
  0x7c   : > { %365 = vst [vmem:[#allocation5 + $0x158] sm:$0xff] %v349_v63  ;;  %v428_v42 = vadd.s32 %v412_v34, %v380_v33  ;;  %v415_v44 = vsel %vm399_vm12, 1, %v555_v17  ;;  %vm402_vm15 = vcmp.eq.s32.totalorder %v706_v61, 3  ;;  %v429_v46 = vadd.s32 %v413_v36, %v381_v35 }
  0x7d   : > { %366 = vst [vmem:[#allocation5 + $0x160] sm:$0xff] %v350_v2  ;;  %v416_v49 = vsel %vm400_vm13, 1, %v555_v17  ;;  %v430_v47 = vadd.s32 %v414_v39, %v382_v38  ;;  %v417_v51 = vsel %vm401_vm14, 1, %v555_v17  ;;  %v431_v52 = vadd.s32 %v415_v44, %v383_v43 }
  0x7e   : > { %367 = vst [vmem:[#allocation5 + $0x168] sm:$0xff] %v351_v10  ;;  %v418_v53 = vsel %vm402_vm15, 1, %v555_v17  ;;  %v432_v54 = vadd.s32 %v416_v49, %v384_v45  ;;  %v433_v55 = vadd.s32 %v417_v51, %v385_v50 }
  0x7f   : > { %368 = vst [vmem:[#allocation5 + $0x170] sm:$0xff] %v352_v4  ;;  %v434_v61 = vadd.s32 %v418_v53, %v386_v48 }
  0x80   : > { %369 = vst [vmem:[#allocation5 + $0x178] sm:$0xff] %v353_v5 }
  0x81   : > { %435 = vst [vmem:[#allocation5 + $0x180] sm:$0xff] %v419_v6 }
  0x82   : > { %436 = vst [vmem:[#allocation5 + $0x188] sm:$0xff] %v420_v12 }
  0x83   : > { %437 = vst [vmem:[#allocation5 + $0x190] sm:$0xff] %v421_v8 }
  0x84   : > { %438 = vst [vmem:[#allocation5 + $0x198] sm:$0xff] %v422_v13 }
  0x85   : > { %439 = vst [vmem:[#allocation5 + $0x1a0] sm:$0xff] %v423_v14 }
  0x86   : > { %440 = vst [vmem:[#allocation5 + $0x1a8] sm:$0xff] %v424_v15 }
  0x87   : > { %441 = vst [vmem:[#allocation5 + $0x1b0] sm:$0xff] %v425_v37 }
  0x88   : > { %442 = vst [vmem:[#allocation5 + $0x1b8] sm:$0xff] %v426_v40 }
  0x89   : > { %443 = vst [vmem:[#allocation5 + $0x1c0] sm:$0xff] %v427_v41 }
  0x8a   : > { %444 = vst [vmem:[#allocation5 + $0x1c8] sm:$0xff] %v428_v42 }
  0x8b   : > { %445 = vst [vmem:[#allocation5 + $0x1d0] sm:$0xff] %v429_v46 }
  0x8c   : > { %446 = vst [vmem:[#allocation5 + $0x1d8] sm:$0xff] %v430_v47  ;;  %101 = sbr.rel (!%p99_p0) target bundleno = 70 (0x46), region = 44 }
  0x8d   : > { %447 = vst [vmem:[#allocation5 + $0x1e0] sm:$0xff] %v431_v52 }
  0x8e   : > { %448 = vst [vmem:[#allocation5 + $0x1e8] sm:$0xff] %v432_v54 }
  0x8f   : > { %449 = vst [vmem:[#allocation5 + $0x1f0] sm:$0xff] %v433_v55 }
  0x90   : > { %450 = vst [vmem:[#allocation5 + $0x1f8] sm:$0xff] %v434_v61 }
  0x91   :  { %463 = dma.vmem_to_hbm [thread:$0]  %s456_s19, 8192, %s458_s17, [#allocation4], %s557_s20, %s557_s20, %s558_s21  }
  0x92   :  { %547 = dma.done.wait [#allocation4], 8192  }
  0x93   :  { %548 = vsyncadd [#allocation4], 4294959104 }
  0x94   :  { %468 = vsyncpa [#allocation3], 1 }
  0x95   :  { %469 = vsyncpa [#allocation4], 1 }

</bundles_post_ra>
